<compile_context>
chip_gen: v5e
topology: v5e:2x2
jax: 0.10.0
libtpu: 0.0.40
codegen_flags: <defaults>
</compile_context>

<pallas_src>
import functools

import jax
import jax.numpy as jnp
from jax import lax
from jax.experimental import pallas as pl
from jax.experimental.pallas import tpu as pltpu

# Module hyper-parameters (from bigram.py)
N_EMBED = 384
HEAD_SIZE = 8
BLOCK_SIZE = 256     # max context length supported by the PyTorch module
DROPOUT_P = 0.15     # TODO(synk): dropout is identity (eval mode); training-mode RNG
                     # dropout is not reproducible vs. PyTorch and is not implemented.

_LANE = 128          # TPU lane width; head dim is zero-padded up to a multiple of this
_NEG_INF = -1e30     # finite "minus infinity" for the causal mask (avoids inf-inf NaNs)


def _pick_batch_block(B, T):
    """How many batch elements to process per grid step."""
    if T % 8 == 0:                       # keep in-kernel reshapes sublane-tile aligned
        for bb in (8, 4, 2):
            if B % bb == 0:
                return bb
    return 1


def _pick_q_tile(T):
    """Query row-tile size for causal tiling (skips upper-triangular work)."""
    for tq in (64, 32, 16, 8):
        if T % tq == 0 and T > tq:
            return tq
    return T                             # single dense tile


def _head_kernel(x_ref, w_ref, o_ref, *, tq):
    # x_ref: (Bb, T, C) activations for Bb batch elements.
    # w_ref: (C, 3*HP) fused [K | Q | V] weights, each zero-padded to HP lanes (bf16).
    # o_ref: (Bb, T, HP) lane-dense padded output (real head lives in [..., :head_size]).
    Bb, T, C = x_ref.shape
    HP = o_ref.shape[-1]

    # ---- fused QKV projection: one MXU pass, M = Bb*T, N = 3*HP ------------------------
    xf = x_ref[...].reshape(Bb * T, C).astype(jnp.bfloat16)
    qkv = jnp.dot(xf, w_ref[...], preferred_element_type=jnp.float32)   # (Bb*T, 3*HP) f32
    qkv = qkv.reshape(Bb, T, 3 * HP)

    k = qkv[:, :, 0 * HP:1 * HP]          # lane-aligned 128-wide slices, no relayout
    q = qkv[:, :, 1 * HP:2 * HP]
    v = qkv[:, :, 2 * HP:3 * HP]

    # NOTE: the PyTorch module scales by C**-0.5 (embedding dim), not head_size**-0.5.
    scale = float(C) ** -0.5
    q = (q * scale).astype(jnp.bfloat16)
    k = k.astype(jnp.bfloat16)
    v = v.astype(jnp.bfloat16)

    # ---- causal attention, tiled over query rows ---------------------------------------
    # Query tile qi only attends to keys [0, (qi+1)*tq): upper-triangular exp/softmax/
    # matmul work is never generated. Only the trailing tq x tq diagonal block of each
    # tile's scores actually needs masking; the prefix is fully visible.
    num_q = T // tq
    for qi in range(num_q):
        r0 = qi * tq
        kv_len = r0 + tq

        q_t = q[:, r0:r0 + tq, :]                     # (Bb, tq, HP)
        k_t = k[:, :kv_len, :]                        # (Bb, kv_len, HP)
        v_t = v[:, :kv_len, :]

        # scores: contraction over the (zero-padded) head dim; no transpose materialized.
        s = jnp.einsum('bqd,bkd->bqk', q_t, k_t,
                       preferred_element_type=jnp.float32)   # (Bb, tq, kv_len) f32

        # Causal mask (only the diagonal block is ever actually masked; the where over
        # the visible prefix is cheap VALU filler under the MXU-bound inner loop).
        row = lax.broadcasted_iota(jnp.int32, (tq, kv_len), 0) + r0
        col = lax.broadcasted_iota(jnp.int32, (tq, kv_len), 1)
        s = jnp.where((col <= row)[None, :, :], s, _NEG_INF)

        # Numerically-stable softmax in f32 (v5e-safe).
        m = jnp.max(s, axis=-1, keepdims=True)
        e = jnp.exp(s - m)
        denom = jnp.sum(e, axis=-1, keepdims=True)
        p = (e * pl.reciprocal(denom, approx=True)).astype(jnp.bfloat16)

        # Dropout on p is identity here (eval mode).

        out_t = jnp.einsum('bqk,bkd->bqd', p, v_t,
                           preferred_element_type=jnp.float32)   # (Bb, tq, HP)
        o_ref[:, r0:r0 + tq, :] = out_t.astype(o_ref.dtype)


def head_forward(x, w_key, w_query, w_value):
    """Single-head causal self-attention.

    x:   (B, T, C) activations.
    w_*: (C, H) pre-transposed nn.Linear weights (forward is x @ W).
    Returns (B, T, H), matching the PyTorch Head.forward (dropout in eval mode).
    """
    B, T, C = x.shape
    H = w_key.shape[1]
    HP = max(_LANE, -(-H // _LANE) * _LANE)           # head dim padded to lane width

    # Fuse + zero-pad [K | Q | V] into one lane-dense bf16 weight (parameter prep; in a
    # real model this fused weight would be built once at load time).
    def pad(w):
        return jnp.zeros((C, HP), jnp.bfloat16).at[:, :H].set(w.astype(jnp.bfloat16))

    w_fused = jnp.concatenate([pad(w_key), pad(w_query), pad(w_value)], axis=1)  # (C, 3*HP)

    Bb = _pick_batch_block(B, T)
    tq = _pick_q_tile(T)

    out_padded = pl.pallas_call(
        functools.partial(_head_kernel, tq=tq),
        out_shape=jax.ShapeDtypeStruct((B, T, HP), x.dtype),
        grid_spec=pltpu.PrefetchScalarGridSpec(
            num_scalar_prefetch=0,
            grid=(B // Bb,),
            in_specs=[
                pl.BlockSpec((Bb, T, C), lambda b: (b, 0, 0)),
                pl.BlockSpec((C, 3 * HP), lambda b: (0, 0)),
            ],
            out_specs=pl.BlockSpec((Bb, T, HP), lambda b: (b, 0, 0)),
        ),
        compiler_params=pltpu.CompilerParams(
            dimension_semantics=("parallel",),
        ),
    )(x, w_fused)

    return out_padded[..., :H]


def _reference(x, w_key, w_query, w_value):
    """Pure-JAX f32 reference mirroring the PyTorch forward (dropout in eval mode)."""
    B, T, C = x.shape
    k = x @ w_key
    q = x @ w_query
    v = x @ w_value
    wei = (q @ jnp.swapaxes(k, -2, -1)) * (C ** -0.5)
    mask = jnp.tril(jnp.ones((T, T), dtype=bool))
    wei = jnp.where(mask[None, :, :], wei, -jnp.inf)
    wei = jax.nn.softmax(wei, axis=-1)
    return wei @ v


if __name__ == "__main__":
    key = jax.random.PRNGKey(0)
    kx, kk, kq, kv = jax.random.split(key, 4)

    # Small shapes consistent with the module; T=16 exercises two causal query tiles.
    B, T, C, H = 2, 16, N_EMBED, HEAD_SIZE

    x = jax.random.normal(kx, (B, T, C), dtype=jnp.float32)

    # Deterministic params, shapes match nn.Linear(n_embed, head_size, bias=False),
    # stored pre-transposed as (C, H) so forward is x @ W.
    init_scale = 1.0 / jnp.sqrt(jnp.float32(C))
    w_key = jax.random.uniform(kk, (C, H), jnp.float32, -init_scale, init_scale)
    w_query = jax.random.uniform(kq, (C, H), jnp.float32, -init_scale, init_scale)
    w_value = jax.random.uniform(kv, (C, H), jnp.float32, -init_scale, init_scale)

    out = jax.block_until_ready(head_forward(x, w_key, w_query, w_value))

    ref = _reference(x, w_key, w_query, w_value)
    assert out.shape == (B, T, H), out.shape
    # bf16 MXU operands -> looser tolerance than the pure-f32 reference.
    max_diff = float(jnp.max(jnp.abs(out - ref)))
    assert jnp.allclose(out, ref, atol=2e-2, rtol=2e-2), (
        "mismatch vs reference; max abs diff = %g" % max_diff)

    print("KERNEL_OK")
</pallas_src>

<mosaic_0001>
module attributes {stable_mosaic.version = 11 : i64} {
  func.func @_head_kernel(%arg0: i32, %arg1: memref<2x16x384xf32, #tpu.memory_space<vmem>>, %arg2: memref<384x384xbf16, #tpu.memory_space<vmem>>, %arg3: memref<2x16x128xf32, #tpu.memory_space<vmem>>) attributes {dimension_semantics = [#tpu.dimension_semantics<parallel>], iteration_bounds = array<i64: 1>, scalar_prefetch = 0 : i64, scratch_operands = 0 : i64, tpu.core_type = #tpu.core_type<tc>, window_params = [{transform_indices = @transform_0, window_bounds = array<i64: 2, 16, 384>}, {pipeline_mode = #tpu.pipeline_mode<synchronous>, transform_indices = @transform_1, window_bounds = array<i64: 384, 384>}, {transform_indices = @transform_2, window_bounds = array<i64: 2, 16, 128>}]} {
    %c0 = arith.constant 0 : index
    %c0_0 = arith.constant 0 : index
    %c0_1 = arith.constant 0 : index
    %0 = vector.load %arg1[%c0, %c0_0, %c0_1] : memref<2x16x384xf32, #tpu.memory_space<vmem>>, vector<2x16x384xf32>
    %1 = vector.shape_cast %0 : vector<2x16x384xf32> to vector<32x384xf32>
    %2 = arith.truncf %1 : vector<32x384xf32> to vector<32x384xbf16>
    %c0_2 = arith.constant 0 : index
    %c0_3 = arith.constant 0 : index
    %3 = vector.load %arg2[%c0_2, %c0_3] : memref<384x384xbf16, #tpu.memory_space<vmem>>, vector<384x384xbf16>
    %cst = arith.constant dense<0.000000e+00> : vector<32x384xf32>
    %4 = tpu.matmul %2, %3, %cst {dimension_numbers = #tpu.dot_dimension_numbers<[1], [0], [0], [1], [0, 0, 1, 1], [], []>} : vector<32x384xbf16>, vector<384x384xbf16>, vector<32x384xf32> -> vector<32x384xf32>
    %5 = vector.shape_cast %4 : vector<32x384xf32> to vector<2x16x384xf32>
    %6 = vector.extract_strided_slice %5 {offsets = [0, 0, 0], sizes = [2, 16, 128], strides = [1, 1, 1]} : vector<2x16x384xf32> to vector<2x16x128xf32>
    %7 = vector.extract_strided_slice %5 {offsets = [0, 0, 128], sizes = [2, 16, 128], strides = [1, 1, 1]} : vector<2x16x384xf32> to vector<2x16x128xf32>
    %8 = vector.extract_strided_slice %5 {offsets = [0, 0, 256], sizes = [2, 16, 128], strides = [1, 1, 1]} : vector<2x16x384xf32> to vector<2x16x128xf32>
    %cst_4 = arith.constant 0.0510310382 : f32
    %9 = vector.broadcast %cst_4 : f32 to vector<2x16x128xf32>
    %10 = arith.mulf %7, %9 : vector<2x16x128xf32>
    %11 = arith.truncf %10 : vector<2x16x128xf32> to vector<2x16x128xbf16>
    %12 = arith.truncf %6 : vector<2x16x128xf32> to vector<2x16x128xbf16>
    %13 = arith.truncf %8 : vector<2x16x128xf32> to vector<2x16x128xbf16>
    %14 = vector.extract_strided_slice %11 {offsets = [0, 0, 0], sizes = [2, 8, 128], strides = [1, 1, 1]} : vector<2x16x128xbf16> to vector<2x8x128xbf16>
    %15 = vector.extract_strided_slice %12 {offsets = [0, 0, 0], sizes = [2, 8, 128], strides = [1, 1, 1]} : vector<2x16x128xbf16> to vector<2x8x128xbf16>
    %16 = vector.extract_strided_slice %13 {offsets = [0, 0, 0], sizes = [2, 8, 128], strides = [1, 1, 1]} : vector<2x16x128xbf16> to vector<2x8x128xbf16>
    "tpu.trace_start"() <{level = 10 : i32, message = "bqd,bkd->bqk"}> : () -> ()
    %cst_5 = arith.constant dense<0.000000e+00> : vector<2x8x8xf32>
    %17 = tpu.matmul %14, %15, %cst_5 {dimension_numbers = #tpu.dot_dimension_numbers<[2], [2], [1], [1], [0, 0, 0, 1, 1, 1], [0], [0]>} : vector<2x8x128xbf16>, vector<2x8x128xbf16>, vector<2x8x8xf32> -> vector<2x8x8xf32>
    "tpu.trace_stop"() : () -> ()
    %18 = tpu.iota {dimensions = array<i32: 0>} : vector<8x8xi32>
    %c0_i32 = arith.constant 0 : i32
    %19 = vector.broadcast %c0_i32 : i32 to vector<8x8xi32>
    %20 = arith.addi %18, %19 : vector<8x8xi32>
    %21 = tpu.iota {dimensions = array<i32: 1>} : vector<8x8xi32>
    %22 = arith.cmpi sle, %21, %20 : vector<8x8xi32>
    %23 = vector.shape_cast %22 : vector<8x8xi1> to vector<1x8x8xi1>
    %cst_6 = arith.constant -1.000000e+30 : f32
    %24 = vector.shape_cast %23 : vector<1x8x8xi1> to vector<1x8x8xi1>
    %25 = vector.broadcast %24 : vector<1x8x8xi1> to vector<2x8x8xi1>
    %26 = vector.broadcast %cst_6 : f32 to vector<2x8x8xf32>
    %27 = arith.select %25, %17, %26 : vector<2x8x8xi1>, vector<2x8x8xf32>
    %cst_7 = arith.constant dense<0xFF800000> : vector<2x8xf32>
    %28 = vector.multi_reduction <maximumf>, %27, %cst_7 [2] : vector<2x8x8xf32> to vector<2x8xf32>
    %29 = vector.shape_cast %28 : vector<2x8xf32> to vector<2x8x1xf32>
    %30 = vector.broadcast %29 : vector<2x8x1xf32> to vector<2x8x8xf32>
    %31 = arith.subf %27, %30 : vector<2x8x8xf32>
    %32 = math.exp %31 : vector<2x8x8xf32>
    %cst_8 = arith.constant dense<0.000000e+00> : vector<2x8xf32>
    %33 = vector.multi_reduction <add>, %32, %cst_8 [2] : vector<2x8x8xf32> to vector<2x8xf32>
    %34 = vector.shape_cast %33 : vector<2x8xf32> to vector<2x8x1xf32>
    %35 = tpu.reciprocal %34 {approx = true} : vector<2x8x1xf32> -> vector<2x8x1xf32>
    %36 = vector.broadcast %35 : vector<2x8x1xf32> to vector<2x8x8xf32>
    %37 = arith.mulf %32, %36 : vector<2x8x8xf32>
    %38 = arith.truncf %37 : vector<2x8x8xf32> to vector<2x8x8xbf16>
    "tpu.trace_start"() <{level = 10 : i32, message = "bqk,bkd->bqd"}> : () -> ()
    %cst_9 = arith.constant dense<0.000000e+00> : vector<2x8x128xf32>
    %39 = tpu.matmul %38, %16, %cst_9 {dimension_numbers = #tpu.dot_dimension_numbers<[2], [1], [1], [2], [0, 0, 0, 1, 1, 2], [0], [0]>} : vector<2x8x8xbf16>, vector<2x8x128xbf16>, vector<2x8x128xf32> -> vector<2x8x128xf32>
    "tpu.trace_stop"() : () -> ()
    %c0_10 = arith.constant 0 : index
    %c0_11 = arith.constant 0 : index
    %c0_12 = arith.constant 0 : index
    %40 = vector.load %arg3[%c0_10, %c0_11, %c0_12] : memref<2x16x128xf32, #tpu.memory_space<vmem>>, vector<2x8x128xf32>
    tpu.vector_store %arg3[%c0_10, %c0_11, %c0_12], %39 {strides = array<i32>} : memref<2x16x128xf32, #tpu.memory_space<vmem>>, vector<2x8x128xf32>,
    %41 = vector.extract_strided_slice %11 {offsets = [0, 8, 0], sizes = [2, 8, 128], strides = [1, 1, 1]} : vector<2x16x128xbf16> to vector<2x8x128xbf16>
    "tpu.trace_start"() <{level = 10 : i32, message = "bqd,bkd->bqk"}> : () -> ()
    %cst_13 = arith.constant dense<0.000000e+00> : vector<2x8x16xf32>
    %42 = tpu.matmul %41, %12, %cst_13 {dimension_numbers = #tpu.dot_dimension_numbers<[2], [2], [1], [1], [0, 0, 0, 1, 1, 1], [0], [0]>} : vector<2x8x128xbf16>, vector<2x16x128xbf16>, vector<2x8x16xf32> -> vector<2x8x16xf32>
    "tpu.trace_stop"() : () -> ()
    %43 = tpu.iota {dimensions = array<i32: 0>} : vector<8x16xi32>
    %c8_i32 = arith.constant 8 : i32
    %44 = vector.broadcast %c8_i32 : i32 to vector<8x16xi32>
    %45 = arith.addi %43, %44 : vector<8x16xi32>
    %46 = tpu.iota {dimensions = array<i32: 1>} : vector<8x16xi32>
    %47 = arith.cmpi sle, %46, %45 : vector<8x16xi32>
    %48 = vector.shape_cast %47 : vector<8x16xi1> to vector<1x8x16xi1>
    %cst_14 = arith.constant -1.000000e+30 : f32
    %49 = vector.shape_cast %48 : vector<1x8x16xi1> to vector<1x8x16xi1>
    %50 = vector.broadcast %49 : vector<1x8x16xi1> to vector<2x8x16xi1>
    %51 = vector.broadcast %cst_14 : f32 to vector<2x8x16xf32>
    %52 = arith.select %50, %42, %51 : vector<2x8x16xi1>, vector<2x8x16xf32>
    %cst_15 = arith.constant dense<0xFF800000> : vector<2x8xf32>
    %53 = vector.multi_reduction <maximumf>, %52, %cst_15 [2] : vector<2x8x16xf32> to vector<2x8xf32>
    %54 = vector.shape_cast %53 : vector<2x8xf32> to vector<2x8x1xf32>
    %55 = vector.broadcast %54 : vector<2x8x1xf32> to vector<2x8x16xf32>
    %56 = arith.subf %52, %55 : vector<2x8x16xf32>
    %57 = math.exp %56 : vector<2x8x16xf32>
    %cst_16 = arith.constant dense<0.000000e+00> : vector<2x8xf32>
    %58 = vector.multi_reduction <add>, %57, %cst_16 [2] : vector<2x8x16xf32> to vector<2x8xf32>
    %59 = vector.shape_cast %58 : vector<2x8xf32> to vector<2x8x1xf32>
    %60 = tpu.reciprocal %59 {approx = true} : vector<2x8x1xf32> -> vector<2x8x1xf32>
    %61 = vector.broadcast %60 : vector<2x8x1xf32> to vector<2x8x16xf32>
    %62 = arith.mulf %57, %61 : vector<2x8x16xf32>
    %63 = arith.truncf %62 : vector<2x8x16xf32> to vector<2x8x16xbf16>
    "tpu.trace_start"() <{level = 10 : i32, message = "bqk,bkd->bqd"}> : () -> ()
    %cst_17 = arith.constant dense<0.000000e+00> : vector<2x8x128xf32>
    %64 = tpu.matmul %63, %13, %cst_17 {dimension_numbers = #tpu.dot_dimension_numbers<[2], [1], [1], [2], [0, 0, 0, 1, 1, 2], [0], [0]>} : vector<2x8x16xbf16>, vector<2x16x128xbf16>, vector<2x8x128xf32> -> vector<2x8x128xf32>
    "tpu.trace_stop"() : () -> ()
    %c0_18 = arith.constant 0 : index
    %c8 = arith.constant 8 : index
    %c0_19 = arith.constant 0 : index
    %65 = vector.load %arg3[%c0_18, %c8, %c0_19] : memref<2x16x128xf32, #tpu.memory_space<vmem>>, vector<2x8x128xf32>
    tpu.vector_store %arg3[%c0_18, %c8, %c0_19], %64 {strides = array<i32>} : memref<2x16x128xf32, #tpu.memory_space<vmem>>, vector<2x8x128xf32>,
    return
  }
  func.func @transform_0(%arg0: i32) -> (i32, i32, i32) {
    %c0_i32 = arith.constant 0 : i32
    %c0_i32_0 = arith.constant 0 : i32
    %c0_i32_1 = arith.constant 0 : i32
    return %arg0, %c0_i32, %c0_i32_0 : i32, i32, i32
  }
  func.func @transform_1(%arg0: i32) -> (i32, i32) {
    %c0_i32 = arith.constant 0 : i32
    %c0_i32_0 = arith.constant 0 : i32
    %c0_i32_1 = arith.constant 0 : i32
    return %c0_i32, %c0_i32_0 : i32, i32
  }
  func.func @transform_2(%arg0: i32) -> (i32, i32, i32) {
    %c0_i32 = arith.constant 0 : i32
    %c0_i32_0 = arith.constant 0 : i32
    %c0_i32_1 = arith.constant 0 : i32
    return %arg0, %c0_i32, %c0_i32_0 : i32, i32, i32
  }
}

</mosaic_0001>

<bundles_post_ra>
// kernel: tpu_custom_call.1
= control target key start
LH: loop header
LB: loop body
LE: loop exit
PB: predicated region body
PF: predicated region fallthrough
CT: control target
= control target key end

     0   :  { %7 = vsyncpa [#allocation3], 0  ;;  %s1530_s0 = inlined_call_operand.hbm [shape: f32[2,16,384], index: 0, kind: input, shape index: {}]   ;;  %s1531_s1 = inlined_call_operand.hbm [shape: bf16[384,384], index: 1, kind: input, shape index: {}]   ;;  %s1532_s2 = inlined_call_operand.hbm [shape: f32[2,16,128], index: 2, kind: output, shape index: {}]  }
   0x1   :  { %8 = vsyncpa [#allocation6], 0 }
   0x2   :  { %9 = vsyncpa [#allocation4], 0  ;;  %s14_s11 = sshll.u32 %s1530_s0, 4  ;;  %s1433_s12 = smov [#allocation2]   ;;  %s15_s11 = int_to_ptr.hbm [resolvable:$true] %s14_s11 }
   0x3   :  { %s16_s13 = sshll.u32 %s1433_s12, 4  ;;  %s27_s16 = sshll.u32 %s1531_s1, 4  ;;  %s17_s13 = int_to_ptr.vmem [resolvable:$true] %s16_s13  ;;  %s28_s16 = int_to_ptr.hbm [resolvable:$true] %s27_s16 }
   0x4   :  { %s1434_s17 = smov 384   ;;  %s1435_s18 = smov 24  }
   0x5   :  { %22 = dma.hbm_to_vmem [thread:$0]  %s15_s11, 1536, %s17_s13, [#allocation3], %s1434_s17, %s1434_s17, %s1435_s18  }
   0x6   :  { %s1436_s19 = smov [#allocation5]   ;;  %s1437_s21 = smov 192  }
   0x7   :  { %s29_s20 = sshll.u32 %s1436_s19, 4  ;;  %s1438_s22 = smov 12   ;;  %s30_s20 = int_to_ptr.vmem [resolvable:$true] %s29_s20 }
   0x8   :  { %35 = dma.hbm_to_vmem [thread:$0]  %s28_s16, 9216, %s30_s20, [#allocation6], %s1437_s21, %s1437_s21, %s1438_s22  }
   0x9   :  { %1427 = dma.done.wait [#allocation3], 1536  }
   0xa   :  { %1428 = vsyncadd [#allocation3], 4294965760 }
   0xb   :  { %1429 = dma.done.wait [#allocation6], 9216  }
   0xc   :  { %1430 = vsyncadd [#allocation6], 4294958080  ;;  %v1052_v0 = vld [vmem:[#allocation5 + $0xa8] sm:$0xf]  ;;  %v1280_v1 = vld [vmem:[#allocation5 + $0xb0] sm:$0xf0] }
   0xd   :  { %v1148_v2 = vld [vmem:[#allocation5 + $0x168] sm:$0xf]  ;;  %v1053_v3 = vor.u32 %v1280_v1, %v1052_v0  ;;  %v1304_v4 = vld [vmem:[#allocation5 + $0x170] sm:$0xf0]  ;;  %v1040_v9 = vld [vmem:[#allocation5 + $0x90] sm:$0xf] }
   0xe   :  { %v1244_v5 = vld [vmem:[#allocation5 + $0x228] sm:$0xf]  ;;  %v1328_v6 = vld [vmem:[#allocation5 + $0x230] sm:$0xf0]  ;;  %v1149_v7 = vor.u32 %v1304_v4, %v1148_v2  ;;  %v1277_v10 = vld [vmem:[#allocation5 + $0x98] sm:$0xf0] }
   0xf   :  { %v1245_v8 = vor.u32 %v1328_v6, %v1244_v5  ;;  %v1136_v11 = vld [vmem:[#allocation5 + $0x150] sm:$0xf]  ;;  %543 = vmatpush.bf16.msra.mxu0 %v1053_v3  ;;  %v1041_v12 = vor.u32 %v1277_v10, %v1040_v9  ;;  %v1301_v13 = vld [vmem:[#allocation5 + $0x158] sm:$0xf0]  ;;  %v1028_v18 = vld [vmem:[#allocation5 + $0x78] sm:$0xf] }
  0x10   :  { %v1232_v14 = vld [vmem:[#allocation5 + $0x210] sm:$0xf]  ;;  %v1325_v15 = vld [vmem:[#allocation5 + $0x218] sm:$0xf0]  ;;  %562 = vmatpush.bf16.msra.mxu1 %v1149_v7  ;;  %v1137_v16 = vor.u32 %v1301_v13, %v1136_v11  ;;  %v1274_v19 = vld [vmem:[#allocation5 + $0x80] sm:$0xf0] }
  0x11   :  { %581 = vmatpush.bf16.msra.mxu2 %v1245_v8  ;;  %v1233_v17 = vor.u32 %v1325_v15, %v1232_v14  ;;  %v1124_v20 = vld [vmem:[#allocation5 + $0x138] sm:$0xf]  ;;  %v1298_v21 = vld [vmem:[#allocation5 + $0x140] sm:$0xf0]  ;;  %v1029_v24 = vor.u32 %v1274_v19, %v1028_v18  ;;  %v1016_v27 = vld [vmem:[#allocation5 + $0x60] sm:$0xf] }
  0x12   :  { %v1220_v22 = vld [vmem:[#allocation5 + $0x1f8] sm:$0xf]  ;;  %v1322_v23 = vld [vmem:[#allocation5 + $0x200] sm:$0xf0]  ;;  %v1125_v25 = vor.u32 %v1298_v21, %v1124_v20  ;;  %v1271_v28 = vld [vmem:[#allocation5 + $0x68] sm:$0xf0] }
  0x13   :  { %544 = vmatpush.bf16.msra.mxu0 %v1041_v12  ;;  %v1221_v26 = vor.u32 %v1322_v23, %v1220_v22  ;;  %v1112_v29 = vld [vmem:[#allocation5 + $0x120] sm:$0xf]  ;;  %v1295_v30 = vld [vmem:[#allocation5 + $0x128] sm:$0xf0]  ;;  %v1017_v33 = vor.u32 %v1271_v28, %v1016_v27  ;;  %v1004_v34 = vld [vmem:[#allocation5 + $0x48] sm:$0xf] }
  0x14   :  { %563 = vmatpush.bf16.msra.mxu1 %v1137_v16  ;;  %v1208_v31 = vld [vmem:[#allocation5 + $0x1e0] sm:$0xf]  ;;  %v1319_v32 = vld [vmem:[#allocation5 + $0x1e8] sm:$0xf0]  ;;  %v1268_v35 = vld [vmem:[#allocation5 + $0x50] sm:$0xf0]  ;;  %v1113_v36 = vor.u32 %v1295_v30, %v1112_v29 }
  0x15   :  { %582 = vmatpush.bf16.msra.mxu2 %v1233_v17  ;;  %v1209_v37 = vor.u32 %v1319_v32, %v1208_v31  ;;  %v1100_v38 = vld [vmem:[#allocation5 + $0x108] sm:$0xf]  ;;  %v1279_v39 = vld [vmem:[#allocation5 + $0xac] sm:$0xf]  ;;  %v1054_v40 = vld [vmem:[#allocation5 + $0xb4] sm:$0xf0]  ;;  %v1005_v46 = vor.u32 %v1268_v35, %v1004_v34 }
  0x16   :  { %v1292_v41 = vld [vmem:[#allocation5 + $0x110] sm:$0xf0]  ;;  %v1196_v42 = vld [vmem:[#allocation5 + $0x1c8] sm:$0xf]  ;;  %v1057_v44 = vor.u32 %v1279_v39, %v1054_v40  ;;  %v992_v47 = vld [vmem:[#allocation5 + $0x30] sm:$0xf] }
  0x17   :  { %545 = vmatpush.bf16.msra.mxu0 %v1029_v24  ;;  %v1316_v43 = vld [vmem:[#allocation5 + $0x1d0] sm:$0xf0]  ;;  %v1265_v48 = vld [vmem:[#allocation5 + $0x38] sm:$0xf0]  ;;  %v1042_v49 = vld [vmem:[#allocation5 + $0x9c] sm:$0xf0]  ;;  %v1101_v50 = vor.u32 %v1292_v41, %v1100_v38 }
  0x18   :  { %564 = vmatpush.bf16.msra.mxu1 %v1125_v25  ;;  %v1276_v45 = vld [vmem:[#allocation5 + $0x94] sm:$0xf]  ;;  %600 = vmatpush.bf16.msra.mxu3 %v1057_v44  ;;  %v1197_v51 = vor.u32 %v1316_v43, %v1196_v42  ;;  %v1088_v52 = vld [vmem:[#allocation5 + $0xf0] sm:$0xf]  ;;  %v1289_v53 = vld [vmem:[#allocation5 + $0xf8] sm:$0xf0]  ;;  %v993_v59 = vor.u32 %v1265_v48, %v992_v47 }
  0x19   :  { %583 = vmatpush.bf16.msra.mxu2 %v1221_v26  ;;  %v1184_v54 = vld [vmem:[#allocation5 + $0x1b0] sm:$0xf]  ;;  %v1045_v55 = vor.u32 %v1276_v45, %v1042_v49  ;;  %v1313_v56 = vld [vmem:[#allocation5 + $0x1b8] sm:$0xf0]  ;;  %v1030_v58 = vld [vmem:[#allocation5 + $0x84] sm:$0xf0]  ;;  %v1089_v63 = vor.u32 %v1289_v53, %v1088_v52 }
  0x1a   :  { %v1273_v57 = vld [vmem:[#allocation5 + $0x7c] sm:$0xf]  ;;  %v980_v60 = vld [vmem:[#allocation5 + $0x18] sm:$0xf]  ;;  %v1262_v61 = vld [vmem:[#allocation5 + $0x20] sm:$0xf0]  ;;  %v1185_v0 = vor.u32 %v1313_v56, %v1184_v54 }
  0x1b   :  { %546 = vmatpush.bf16.msra.mxu0 %v1017_v33  ;;  %v1033_v62 = vor.u32 %v1273_v57, %v1030_v58  ;;  %v1076_v1 = vld [vmem:[#allocation5 + $0xd8] sm:$0xf]  ;;  %v1270_v2 = vld [vmem:[#allocation5 + $0x64] sm:$0xf]  ;;  %v1018_v3 = vld [vmem:[#allocation5 + $0x6c] sm:$0xf0]  ;;  %v981_v7 = vor.u32 %v1262_v61, %v980_v60 }
  0x1c   :  { %565 = vmatpush.bf16.msra.mxu1 %v1113_v36  ;;  %601 = vmatpush.bf16.msra.mxu3 %v1045_v55  ;;  %v1286_v4 = vld [vmem:[#allocation5 + $0xe0] sm:$0xf0]  ;;  %v1172_v5 = vld [vmem:[#allocation5 + $0x198] sm:$0xf]  ;;  %v968_v8 = vld [vmem:[#allocation5] sm:$0xf]  ;;  %v1021_v11 = vor.u32 %v1270_v2, %v1018_v3 }
  0x1d   :  { %584 = vmatpush.bf16.msra.mxu2 %v1209_v37  ;;  %v1310_v6 = vld [vmem:[#allocation5 + $0x1a0] sm:$0xf0]  ;;  %v1259_v9 = vld [vmem:[#allocation5 + $0x8] sm:$0xf0]  ;;  %v1064_v10 = vld [vmem:[#allocation5 + $0xc0] sm:$0xf]  ;;  %v1077_v12 = vor.u32 %v1286_v4, %v1076_v1 }
  0x1e   :  { %v1173_v13 = vor.u32 %v1310_v6, %v1172_v5  ;;  %v1283_v14 = vld [vmem:[#allocation5 + $0xc8] sm:$0xf0]  ;;  %v1006_v16 = vld [vmem:[#allocation5 + $0x54] sm:$0xf0]  ;;  %v1160_v17 = vld [vmem:[#allocation5 + $0x180] sm:$0xf]  ;;  %v969_v23 = vor.u32 %v1259_v9, %v968_v8 }
  0x1f   :  { %547 = vmatpush.bf16.msra.mxu0 %v1005_v46  ;;  %v1267_v15 = vld [vmem:[#allocation5 + $0x4c] sm:$0xf]  ;;  %v1150_v20 = vld [vmem:[#allocation5 + $0x174] sm:$0xf0]  ;;  %v45_v24 = vld [vmem:[#allocation2] sm:$0xff]  ;;  %v1065_v28 = vor.u32 %v1283_v14, %v1064_v10  ;;  %vm793_vm0 = vcmask 1043456  }
  0x20   :  { %566 = vmatpush.bf16.msra.mxu1 %v1101_v50  ;;  %602 = vmatpush.bf16.msra.mxu3 %v1033_v62  ;;  %v1307_v18 = vld [vmem:[#allocation5 + $0x188] sm:$0xf0]  ;;  %v1246_v22 = vld [vmem:[#allocation5 + $0x234] sm:$0xf0]  ;;  %v1009_v27 = vor.u32 %v1267_v15, %v1006_v16  ;;  %v49_v30 = vld [vmem:[#allocation2 + $0x20] sm:$0xff]  ;;  %vm765_vm2 = vcmask 64512  }
  0x21   :  { %585 = vmatpush.bf16.msra.mxu2 %v1197_v51  ;;  %v1303_v19 = vld [vmem:[#allocation5 + $0x16c] sm:$0xf]  ;;  %v48_v25 = vld [vmem:[#allocation2 + $0x18] sm:$0xff]  ;;  %v1161_v29 = vor.u32 %v1307_v18, %v1160_v17  ;;  %v47_v31 = vld [vmem:[#allocation2 + $0x10] sm:$0xff]  ;;  %vm875_vm4 = vcmask 130048   ;;  %s1439_s0 = smov [#allocation7]  }
  0x22   :  { %v1327_v21 = vld [vmem:[#allocation5 + $0x22c] sm:$0xf]  ;;  %v1153_v33 = vor.u32 %v1303_v19, %v1150_v20  ;;  %v1300_v35 = vld [vmem:[#allocation5 + $0x154] sm:$0xf]  ;;  %v994_v37 = vld [vmem:[#allocation5 + $0x3c] sm:$0xf0]  ;;  %v1463_v38 = vpack.c.bf16 %v48_v25, %v45_v24 }
  0x23   :  { %548 = vmatpush.bf16.msra.mxu0 %v993_v59  ;;  %v46_v26 = vld [vmem:[#allocation2 + $0x8] sm:$0xff]  ;;  %v1249_v34 = vor.u32 %v1327_v21, %v1246_v22  ;;  %v1264_v36 = vld [vmem:[#allocation5 + $0x34] sm:$0xf]  ;;  %v1138_v39 = vld [vmem:[#allocation5 + $0x15c] sm:$0xf0]  ;;  %s950_s1 = sshll.u32 %s1439_s0, 4  ;;  %s951_s1 = int_to_ptr.vmem [resolvable:$true] %s950_s1 }
  0x24   :  { %567 = vmatpush.bf16.msra.mxu1 %v1089_v63  ;;  %603 = vmatpush.bf16.msra.mxu3 %v1021_v11  ;;  %v50_v32 = vld [vmem:[#allocation2 + $0x28] sm:$0xff]  ;;  %v1324_v40 = vld [vmem:[#allocation5 + $0x214] sm:$0xf]  ;;  %v1234_v41 = vld [vmem:[#allocation5 + $0x21c] sm:$0xf0]  ;;  %v1465_v42 = vpack.c.bf16 %v49_v30, %v46_v26  ;;  %v997_v44 = vor.u32 %v1264_v36, %v994_v37  ;;  %v1141_v46 = vor.u32 %v1300_v35, %v1138_v39  ;;  %s952_s25 = sshll.u32 %s1532_s2, 4  ;;  %s953_s25 = int_to_ptr.hbm [resolvable:$true] %s952_s25 }
  0x25   :  { %586 = vmatpush.bf16.msra.mxu2 %v1185_v0  ;;  %v1467_v43 = vpack.c.bf16 %v50_v32, %v47_v31  ;;  %v1297_v45 = vld [vmem:[#allocation5 + $0x13c] sm:$0xf]  ;;  %v1237_v47 = vor.u32 %v1324_v40, %v1234_v41  ;;  %v1126_v48 = vld [vmem:[#allocation5 + $0x144] sm:$0xf0]  ;;  %v1060_v53 = vld [vmem:[#allocation5 + $0xb0] sm:$0xf] }
  0x26   :  { %v1261_v49 = vld [vmem:[#allocation5 + $0x1c] sm:$0xf]  ;;  %v982_v50 = vld [vmem:[#allocation5 + $0x24] sm:$0xf0]  ;;  %v1294_v56 = vld [vmem:[#allocation5 + $0x124] sm:$0xf]  ;;  %v1129_v60 = vor.u32 %v1297_v45, %v1126_v48 }
  0x27   :  { %549 = vmatpush.bf16.msra.mxu0 %v981_v7  ;;  %v1321_v51 = vld [vmem:[#allocation5 + $0x1fc] sm:$0xf]  ;;  %v1222_v52 = vld [vmem:[#allocation5 + $0x204] sm:$0xf0]  ;;  %v985_v55 = vor.u32 %v1261_v49, %v982_v50  ;;  %v1114_v57 = vld [vmem:[#allocation5 + $0x12c] sm:$0xf0] }
  0x28   :  { %568 = vmatpush.bf16.msra.mxu1 %v1077_v12  ;;  %604 = vmatpush.bf16.msra.mxu3 %v1009_v27  ;;  %v1281_v54 = vld [vmem:[#allocation5 + $0xb8] sm:$0xf0]  ;;  %v1258_v58 = vld [vmem:[#allocation5 + $0x4] sm:$0xf]  ;;  %v1225_v61 = vor.u32 %v1321_v51, %v1222_v52  ;;  %v970_v62 = vld [vmem:[#allocation5 + $0xc] sm:$0xf0]  ;;  %v1117_v9 = vor.u32 %v1294_v56, %v1114_v57 }
  0x29   :  { %587 = vmatpush.bf16.msra.mxu2 %v1173_v13  ;;  %v1061_v59 = vor.u32 %v1281_v54, %v1060_v53  ;;  %v1048_v63 = vld [vmem:[#allocation5 + $0x98] sm:$0xf]  ;;  %v1278_v0 = vld [vmem:[#allocation5 + $0xa0] sm:$0xf0]  ;;  %v1210_v2 = vld [vmem:[#allocation5 + $0x1ec] sm:$0xf0]  ;;  %v973_v8 = vor.u32 %v1258_v58, %v970_v62 }
  0x2a   :  { %v1318_v1 = vld [vmem:[#allocation5 + $0x1e4] sm:$0xf]  ;;  %v1156_v3 = vld [vmem:[#allocation5 + $0x170] sm:$0xf]  ;;  %v1049_v4 = vor.u32 %v1278_v0, %v1048_v63  ;;  %v1305_v5 = vld [vmem:[#allocation5 + $0x178] sm:$0xf0] }
  0x2b   :  { %550 = vmatpush.bf16.msra.mxu0 %v969_v23  ;;  %v1036_v6 = vld [vmem:[#allocation5 + $0x80] sm:$0xf]  ;;  %v1275_v7 = vld [vmem:[#allocation5 + $0x88] sm:$0xf0]  ;;  %v1213_v10 = vor.u32 %v1318_v1, %v1210_v2  ;;  %v51_v11 = vld [vmem:[#allocation2 + $0x30] sm:$0xff]  ;;  %v1157_v17 = vor.u32 %v1305_v5, %v1156_v3  ;;  %s1440_s26 = smov 128  }
  0x2c   :  { %569 = vmatpush.bf16.msra.mxu1 %v1065_v28  ;;  %605 = vmatpush.bf16.msra.mxu3 %v997_v44  ;;  %v54_v12 = vld [vmem:[#allocation2 + $0x48] sm:$0xff]  ;;  %v1102_v14 = vld [vmem:[#allocation5 + $0x114] sm:$0xf0]  ;;  %v1037_v18 = vor.u32 %v1275_v7, %v1036_v6  ;;  %v1302_v21 = vld [vmem:[#allocation5 + $0x160] sm:$0xf0]  ;;  %s1441_s27 = smov 8  }
  0x2d   :  { %588 = vmatpush.bf16.msra.mxu2 %v1161_v29  ;;  %v1291_v13 = vld [vmem:[#allocation5 + $0x10c] sm:$0xf]  ;;  %v1198_v16 = vld [vmem:[#allocation5 + $0x1d4] sm:$0xf0]  ;;  %v55_v22 = vld [vmem:[#allocation2 + $0x50] sm:$0xff]  ;;  %v1472_v30 = vpack.c.bf16 %v54_v12, %v51_v11 }
  0x2e   :  { %551 = vmatmul.bf16.vlgmr.msra.gmra.mxu0 %v1463_v38  ;;  %v1315_v15 = vld [vmem:[#allocation5 + $0x1cc] sm:$0xf]  ;;  %v52_v19 = vld [vmem:[#allocation2 + $0x38] sm:$0xff]  ;;  %v53_v23 = vld [vmem:[#allocation2 + $0x40] sm:$0xff]  ;;  %v1105_v25 = vor.u32 %v1291_v13, %v1102_v14 }
  0x2f   :  { %619 = vmatpush.bf16.msrb.mxu0 %v1153_v33  ;;  %570 = vmatmul.bf16.vlgmr.msra.gmra.mxu1 %v1465_v42  ;;  %v1144_v20 = vld [vmem:[#allocation5 + $0x158] sm:$0xf]  ;;  %v1201_v26 = vor.u32 %v1315_v15, %v1198_v16  ;;  %v1288_v27 = vld [vmem:[#allocation5 + $0xf4] sm:$0xf]  ;;  %v1024_v28 = vld [vmem:[#allocation5 + $0x68] sm:$0xf]  ;;  %v1474_v35 = vpack.c.bf16 %v55_v22, %v52_v19 }
  0x30   :  { %638 = vmatpush.bf16.msrb.mxu1 %v1249_v34  ;;  %589 = vmatmul.bf16.vlgmr.msra.gmra.mxu2 %v1467_v43  ;;  %v56_v24 = vld [vmem:[#allocation2 + $0x58] sm:$0xff]  ;;  %v1272_v29 = vld [vmem:[#allocation5 + $0x70] sm:$0xf0]  ;;  %v1090_v31 = vld [vmem:[#allocation5 + $0xfc] sm:$0xf0]  ;;  %v1145_v34 = vor.u32 %v1302_v21, %v1144_v20 }
  0x31   :  { %657 = vmatpush.bf16.msrb.mxu2 %v1061_v59  ;;  %606 = vmatpush.bf16.msra.mxu3 %v985_v55  ;;  %v1312_v32 = vld [vmem:[#allocation5 + $0x1b4] sm:$0xf]  ;;  %v1186_v33 = vld [vmem:[#allocation5 + $0x1bc] sm:$0xf0]  ;;  %v1476_v36 = vpack.c.bf16 %v56_v24, %v53_v23  ;;  %v1299_v39 = vld [vmem:[#allocation5 + $0x148] sm:$0xf0]  ;;  %v1025_v40 = vor.u32 %v1272_v29, %v1024_v28  ;;  %v1093_v41 = vor.u32 %v1288_v27, %v1090_v31 }
  0x32   :  { %v1132_v37 = vld [vmem:[#allocation5 + $0x140] sm:$0xf]  ;;  %v1189_v44 = vor.u32 %v1312_v32, %v1186_v33  ;;  %v1285_v45 = vld [vmem:[#allocation5 + $0xdc] sm:$0xf]  ;;  %v1078_v48 = vld [vmem:[#allocation5 + $0xe4] sm:$0xf0] }
  0x33   :  { %620 = vmatpush.bf16.msrb.mxu0 %v1141_v46  ;;  %v1012_v46 = vld [vmem:[#allocation5 + $0x50] sm:$0xf]  ;;  %v1309_v49 = vld [vmem:[#allocation5 + $0x19c] sm:$0xf]  ;;  %v1174_v50 = vld [vmem:[#allocation5 + $0x1a4] sm:$0xf0]  ;;  %v1133_v51 = vor.u32 %v1299_v39, %v1132_v37  ;;  %v1081_v56 = vor.u32 %v1285_v45, %v1078_v48 }
  0x34   :  { %639 = vmatpush.bf16.msrb.mxu1 %v1237_v47  ;;  %v1269_v47 = vld [vmem:[#allocation5 + $0x58] sm:$0xf0]  ;;  %v1120_v52 = vld [vmem:[#allocation5 + $0x128] sm:$0xf]  ;;  %v1296_v53 = vld [vmem:[#allocation5 + $0x130] sm:$0xf0]  ;;  %v1177_v57 = vor.u32 %v1309_v49, %v1174_v50 }
  0x35   :  { %658 = vmatpush.bf16.msrb.mxu2 %v1049_v4  ;;  %607 = vmatpush.bf16.msra.mxu3 %v973_v8  ;;  %v1282_v54 = vld [vmem:[#allocation5 + $0xc4] sm:$0xf]  ;;  %v1013_v55 = vor.u32 %v1269_v47, %v1012_v46  ;;  %v1066_v58 = vld [vmem:[#allocation5 + $0xcc] sm:$0xf0]  ;;  %v1000_v59 = vld [vmem:[#allocation5 + $0x38] sm:$0xf]  ;;  %v1121_v0 = vor.u32 %v1296_v53, %v1120_v52 }
  0x36   :  { %v1162_v62 = vld [vmem:[#allocation5 + $0x18c] sm:$0xf0]  ;;  %v1329_v1 = vld [vmem:[#allocation5 + $0x238] sm:$0xf0]  ;;  %v1069_v5 = vor.u32 %v1282_v54, %v1066_v58  ;;  %v988_v7 = vld [vmem:[#allocation5 + $0x20] sm:$0xf] }
  0x37   :  { %621 = vmatpush.bf16.msrb.mxu0 %v1129_v60  ;;  %v1266_v60 = vld [vmem:[#allocation5 + $0x40] sm:$0xf0]  ;;  %v1252_v63 = vld [vmem:[#allocation5 + $0x230] sm:$0xf]  ;;  %v1293_v3 = vld [vmem:[#allocation5 + $0x118] sm:$0xf0] }
  0x38   :  { %640 = vmatpush.bf16.msrb.mxu1 %v1225_v61  ;;  %608 = vmatmul.bf16.vlgmr.msra.gmra.mxu3 %v1463_v38  ;;  %v1306_v61 = vld [vmem:[#allocation5 + $0x184] sm:$0xf]  ;;  %v1108_v2 = vld [vmem:[#allocation5 + $0x110] sm:$0xf]  ;;  %v1001_v4 = vor.u32 %v1266_v60, %v1000_v59  ;;  %v1263_v8 = vld [vmem:[#allocation5 + $0x28] sm:$0xf0] }
  0x39   :  { %676 = vmatpush.bf16.msrb.mxu3 %v1157_v17  ;;  %659 = vmatpush.bf16.msrb.mxu2 %v1037_v18  ;;  %v1165_v6 = vor.u32 %v1306_v61, %v1162_v62  ;;  %v1096_v11 = vld [vmem:[#allocation5 + $0xf8] sm:$0xf]  ;;  %v1290_v12 = vld [vmem:[#allocation5 + $0x100] sm:$0xf0]  ;;  %v989_v15 = vor.u32 %v1263_v8, %v988_v7  ;;  %v976_v16 = vld [vmem:[#allocation5 + $0x8] sm:$0xf] }
  0x3a   :  { %v1240_v13 = vld [vmem:[#allocation5 + $0x218] sm:$0xf]  ;;  %v1326_v14 = vld [vmem:[#allocation5 + $0x220] sm:$0xf0]  ;;  %v1260_v17 = vld [vmem:[#allocation5 + $0x10] sm:$0xf0]  ;;  %v1097_v18 = vor.u32 %v1290_v12, %v1096_v11 }
  0x3b   :  { %622 = vmatpush.bf16.msrb.mxu0 %v1117_v9  ;;  %v1253_v9 = vor.u32 %v1329_v1, %v1252_v63  ;;  %v1241_v19 = vor.u32 %v1326_v14, %v1240_v13  ;;  %v1084_v20 = vld [vmem:[#allocation5 + $0xe0] sm:$0xf]  ;;  %v1287_v21 = vld [vmem:[#allocation5 + $0xe8] sm:$0xf0]  ;;  %v977_v24 = vor.u32 %v1260_v17, %v976_v16  ;;  %v1072_v27 = vld [vmem:[#allocation5 + $0xc8] sm:$0xf] }
  0x3c   :  { %641 = vmatpush.bf16.msrb.mxu1 %v1213_v10  ;;  %v1109_v10 = vor.u32 %v1293_v3, %v1108_v2  ;;  %v1228_v22 = vld [vmem:[#allocation5 + $0x200] sm:$0xf]  ;;  %v1323_v23 = vld [vmem:[#allocation5 + $0x208] sm:$0xf0]  ;;  %v1284_v28 = vld [vmem:[#allocation5 + $0xd0] sm:$0xf0] }
  0x3d   :  { %677 = vmatpush.bf16.msrb.mxu3 %v1145_v34  ;;  %660 = vmatpush.bf16.msrb.mxu2 %v1025_v40  ;;  %v1216_v29 = vld [vmem:[#allocation5 + $0x1e8] sm:$0xf]  ;;  %v1320_v31 = vld [vmem:[#allocation5 + $0x1f0] sm:$0xf0]  ;;  %v1073_v32 = vor.u32 %v1284_v28, %v1072_v27  ;;  %v1204_v34 = vld [vmem:[#allocation5 + $0x1d0] sm:$0xf] }
  0x3e   :  { %556 = vmatmul.bf16.gmra.mxu0 %v1472_v30  ;;  %v1217_v33 = vor.u32 %v1320_v31, %v1216_v29  ;;  %v1317_v37 = vld [vmem:[#allocation5 + $0x1d8] sm:$0xf0]  ;;  %v1192_v40 = vld [vmem:[#allocation5 + $0x1b8] sm:$0xf]  ;;  %v1180_v45 = vld [vmem:[#allocation5 + $0x1a0] sm:$0xf] }
  0x3f   :  { %623 = vmatpush.bf16.msrb.mxu0 %v1105_v25  ;;  %575 = vmatmul.bf16.gmra.mxu1 %v1474_v35  ;;  %v1085_v25 = vor.u32 %v1287_v21, %v1084_v20  ;;  %v1205_v39 = vor.u32 %v1317_v37, %v1204_v34  ;;  %v1311_v46 = vld [vmem:[#allocation5 + $0x1a8] sm:$0xf0]  ;;  %v1308_v48 = vld [vmem:[#allocation5 + $0x190] sm:$0xf0] }
  0x40   :  { %642 = vmatpush.bf16.msrb.mxu1 %v1201_v26  ;;  %594 = vmatmul.bf16.gmra.mxu2 %v1476_v36  ;;  %v1229_v26 = vor.u32 %v1323_v23, %v1228_v22  ;;  %v1181_v47 = vor.u32 %v1311_v46, %v1180_v45 }
  0x41   :  { %678 = vmatpush.bf16.msrb.mxu3 %v1133_v51  ;;  %661 = vmatpush.bf16.msrb.mxu2 %v1013_v55 }
  0x43   :  { %624 = vmatpush.bf16.msrb.mxu0 %v1093_v41  ;;  %v1314_v41 = vld [vmem:[#allocation5 + $0x1c0] sm:$0xf0] }
  0x44   :  { %643 = vmatpush.bf16.msrb.mxu1 %v1189_v44  ;;  %v1193_v44 = vor.u32 %v1314_v41, %v1192_v40 }
  0x45   :  { %679 = vmatpush.bf16.msrb.mxu3 %v1121_v0  ;;  %662 = vmatpush.bf16.msrb.mxu2 %v1001_v4 }
  0x47   :  { %625 = vmatpush.bf16.msrb.mxu0 %v1081_v56 }
  0x48   :  { %644 = vmatpush.bf16.msrb.mxu1 %v1177_v57  ;;  %613 = vmatmul.bf16.gmra.mxu3 %v1472_v30 }
  0x49   :  { %680 = vmatpush.bf16.msrb.mxu3 %v1109_v10  ;;  %663 = vmatpush.bf16.msrb.mxu2 %v989_v15 }
  0x4b   :  { %626 = vmatpush.bf16.msrb.mxu0 %v1069_v5 }
  0x4c   :  { %645 = vmatpush.bf16.msrb.mxu1 %v1165_v6 }
  0x4d   :  { %681 = vmatpush.bf16.msrb.mxu3 %v1097_v18  ;;  %664 = vmatpush.bf16.msrb.mxu2 %v977_v24 }
  0x4e   :  { %627 = vmatmul.bf16.vlgmr.msrb.gmra.mxu0 %v1465_v42 }
  0x4f   :  { %695 = vmatpush.bf16.msra.mxu0 %v1253_v9  ;;  %646 = vmatmul.bf16.vlgmr.msrb.gmra.mxu1 %v1467_v43 }
  0x50   :  { %665 = vmatmul.bf16.vlgmr.msrb.gmra.mxu2 %v1463_v38  ;;  %v1168_v38 = vld [vmem:[#allocation5 + $0x188] sm:$0xf] }
  0x51   :  { %682 = vmatpush.bf16.msrb.mxu3 %v1085_v25  ;;  %v1169_v49 = vor.u32 %v1308_v48, %v1168_v38  ;;  %v756_v38 = vlaneseq }
  0x53   :  { %696 = vmatpush.bf16.msra.mxu0 %v1241_v19 }
  0x55   :  { %683 = vmatpush.bf16.msrb.mxu3 %v1073_v32 }
  0x57   :  { %697 = vmatpush.bf16.msra.mxu0 %v1229_v26 }
  0x58   :  { %684 = vmatmul.bf16.vlgmr.msrb.gmra.mxu3 %v1465_v42 }
  0x5b   :  { %698 = vmatpush.bf16.msra.mxu0 %v1217_v33 }
  0x5e   :  { %632 = vmatmul.bf16.gmra.mxu0 %v1474_v35 }
  0x5f   :  { %699 = vmatpush.bf16.msra.mxu0 %v1205_v39  ;;  %651 = vmatmul.bf16.gmra.mxu1 %v1476_v36 }
  0x60   :  { %670 = vmatmul.bf16.gmra.mxu2 %v1472_v30 }
  0x63   :  { %700 = vmatpush.bf16.msra.mxu0 %v1193_v44 }
  0x67   :  { %701 = vmatpush.bf16.msra.mxu0 %v1181_v47 }
  0x68   :  { %689 = vmatmul.bf16.gmra.mxu3 %v1474_v35 }
  0x6b   :  { %702 = vmatpush.bf16.msra.mxu0 %v1169_v49 }
  0x6e   :  { %703 = vmatmul.bf16.vlgmr.msra.gmra.mxu0 %v1467_v43 }
  0x7e   :  { %708 = vmatmul.bf16.gmra.mxu0 %v1476_v36 }
  0xab   :  { %v552_v42 = vpop.f32.mrf.mxu0 }
  0xac   :  { %v571_v50 = vpop.f32.mrf.mxu1 }
  0xad   :  { %v572_v51 = vadd.f32 %v571_v50, %v552_v42  ;;  %v757_v42 = vshrl.u32 %v756_v38, 7  ;;  %v1496_v50 = vand.u32 127, %v756_v38 }
  0xaf   :  { %vm760_vm1 = vcmp.le.s32.totalorder %v1496_v50, %v757_v42 }
  0xb3   :  { %v590_v52 = vpop.f32.mrf.mxu2  ;;  %v554_v54 = vpop.f32.mrf.mxu0 }
  0xb4   :  { %v591_v53 = vadd.f32 %v590_v52, %v572_v51  ;;  %v573_v55 = vpop.f32.mrf.mxu1 }
  0xb5   :  { %v574_v57 = vadd.f32 %v573_v55, %v554_v54 }
  0xb6   :  { %v722_v56 = vpack.c.bf16 %v591_v53, %v591_v53 }
  0xb8   :  { %737 = vmatpush.bf16.xpose.msra.mxu1 %v722_v56  ;;  %v833_v1 = vunpack.c.l.b16 %v722_v56 }
  0xbb   :  { %v592_v58 = vpop.f32.mrf.mxu2  ;;  %v557_v30 = vpop.f32.mrf.mxu0 }
  0xbc   :  { %v593_v59 = vadd.f32 %v592_v58, %v574_v57  ;;  %v576_v60 = vpop.f32.mrf.mxu1  ;;  %v609_v35 = vpop.f32.mrf.mxu3 }
  0xbd   :  { %v577_v62 = vadd.f32 %v576_v60, %v557_v30  ;;  %v1504_v60 = vadd.s32 8, %v757_v42 }
  0xbe   :  { %v723_v61 = vpack.c.bf16 %v593_v59, %v593_v59 }
  0xbf   :  { %vm870_vm3 = vcmp.le.s32.totalorder %v1496_v50, %v1504_v60 }
  0xc0   :  { %v834_v43 = vunpack.c.l.b16 %v723_v61 }
  0xc2   :  { %v835_v4 = vpack.c.b16 %v834_v43, %v833_v1 }
  0xc3   :  { %v595_v63 = vpop.f32.mrf.mxu2  ;;  %v559_v0 = vpop.f32.mrf.mxu0 }
  0xc4   :  { %v596_v36 = vadd.f32 %v595_v63, %v577_v62  ;;  %v578_v2 = vpop.f32.mrf.mxu1  ;;  %v611_v5 = vpop.f32.mrf.mxu3 }
  0xc5   :  { %v579_v22 = vadd.f32 %v578_v2, %v559_v0 }
  0xc6   :  { %v724_v3 = vpack.c.bf16 %v596_v36, %v596_v36 }
  0xc8   :  { %750 = vmatpush.bf16.xpose.msra.mxu2 %v724_v3  ;;  %v852_v40 = vunpack.c.l.b16 %v724_v3 }
  0xcb   :  { %v628_v6 = vpop.f32.mrf.mxu0  ;;  %v597_v19 = vpop.f32.mrf.mxu2 }
  0xcc   :  { %v629_v7 = vadd.f32 %v628_v6, %v609_v35  ;;  %v647_v8 = vpop.f32.mrf.mxu1  ;;  %v614_v11 = vpop.f32.mrf.mxu3  ;;  %v598_v25 = vadd.f32 %v597_v19, %v579_v22 }
  0xce   :  { %v648_v9 = vadd.f32 %v647_v8, %v629_v7  ;;  %v725_v31 = vpack.c.bf16 %v598_v25, %v598_v25 }
  0xd0   :  { %844 = vmatpush.bf16.xpose.msrb.mxu2 %v835_v4  ;;  %v714_v10 = vmul.f32 0.05103104, %v648_v9  ;;  %v853_v37 = vunpack.c.l.b16 %v725_v31 }
  0xd2   :  { %v718_v12 = vpack.c.bf16 %v714_v10, %v714_v10  ;;  %v854_v45 = vpack.c.b16 %v853_v37, %v852_v40 }
  0xd3   :  { %v630_v13 = vpop.f32.mrf.mxu0  ;;  %v666_v27 = vpop.f32.mrf.mxu2 }
  0xd4   :  { %v649_v14 = vpop.f32.mrf.mxu1  ;;  %738 = vmatmul.bf16.vlgmr.msra.gmra.mxu1 %v718_v12  ;;  %v616_v16 = vpop.f32.mrf.mxu3  ;;  %v631_v29 = vadd.f32 %v630_v13, %v611_v5 }
  0xd6   :  { %v650_v33 = vadd.f32 %v649_v14, %v631_v29 }
  0xd8   :  { %v715_v41 = vmul.f32 0.05103104, %v650_v33 }
  0xda   :  { %v719_v47 = vpack.c.bf16 %v715_v41, %v715_v41 }
  0xdb   :  { %v633_v15 = vpop.f32.mrf.mxu0  ;;  %v668_v49 = vpop.f32.mrf.mxu2 }
  0xdc   :  { %v634_v17 = vadd.f32 %v633_v15, %v614_v11  ;;  %v652_v18 = vpop.f32.mrf.mxu1  ;;  %v685_v28 = vpop.f32.mrf.mxu3 }
  0xdd   :  { %v686_v32 = vadd.f32 %v685_v28, %v666_v27 }
  0xde   :  { %v653_v20 = vadd.f32 %v652_v18, %v634_v17 }
  0xe0   :  { %v716_v21 = vmul.f32 0.05103104, %v653_v20 }
  0xe2   :  { %v720_v23 = vpack.c.bf16 %v716_v21, %v716_v21 }
  0xe3   :  { %v635_v24 = vpop.f32.mrf.mxu0  ;;  %v671_v54 = vpop.f32.mrf.mxu2 }
  0xe4   :  { %v1493_v26 = vadd.f32 %v635_v24, %v616_v16  ;;  %751 = vmatmul.bf16.vlgmr.msra.gmra.mxu2 %v720_v23  ;;  %v654_v48 = vpop.f32.mrf.mxu1  ;;  %v687_v3 = vpop.f32.mrf.mxu3 }
  0xe5   :  { %v688_v5 = vadd.f32 %v687_v3, %v668_v49 }
  0xe6   :  { %v655_v21 = vadd.f32 %v654_v48, %v1493_v26 }
  0xe8   :  { %v717_v27 = vmul.f32 0.05103104, %v655_v21 }
  0xea   :  { %v721_v31 = vpack.c.bf16 %v717_v27, %v717_v27 }
  0xeb   :  { %v704_v34 = vpop.f32.mrf.mxu0  ;;  %v673_v56 = vpop.f32.mrf.mxu2 }
  0xec   :  { %v705_v39 = vadd.f32 %v704_v34, %v686_v32  ;;  %v690_v22 = vpop.f32.mrf.mxu3 }
  0xed   :  { %v691_v24 = vadd.f32 %v690_v22, %v671_v54 }
  0xee   :  { %v726_v44 = vpack.c.bf16 %v705_v39, %v705_v39 }
  0xf0   :  { %v795_v46 = vsel %vm793_vm0, %v726_v44, 0  ;;  %v902_v7 = vunpack.c.l.b16 %v726_v44 }
  0xf1   :  { %804 = vmatpush.bf16.msra.mxu3 %v795_v46 }
  0xf3   :  { %v706_v4 = vpop.f32.mrf.mxu0 }
  0xf4   :  { %845 = vmatmul.bf16.vlgmr.msrb.gmra.mxu2 %v719_v47  ;;  %v707_v6 = vadd.f32 %v706_v4, %v688_v5  ;;  %v692_v32 = vpop.f32.mrf.mxu3 }
  0xf5   :  { %863 = vmatpush.bf16.xpose.msrb.mxu3 %v854_v45  ;;  %v693_v34 = vadd.f32 %v692_v32, %v673_v56 }
  0xf6   :  { %v727_v8 = vpack.c.bf16 %v707_v6, %v707_v6 }
  0xf8   :  { %v903_v9 = vunpack.c.l.b16 %v727_v8 }
  0xfa   :  { %v904_v10 = vpack.c.b16 %v903_v9, %v902_v7 }
  0xfb   :  { %v709_v23 = vpop.f32.mrf.mxu0 }
  0xfc   :  { %916 = vmatpush.bf16.msrb.mxu0 %v904_v10  ;;  %v710_v25 = vadd.f32 %v709_v23, %v691_v24 }
  0xfe   :  { %v728_v28 = vpack.c.bf16 %v710_v25, %v710_v25 }
 0x100   :  { %v814_v29 = vsel %vm793_vm0, %v728_v28, 0  ;;  %v924_v39 = vunpack.c.l.b16 %v728_v28 }
 0x101   :  { %823 = vmatpush.bf16.msrb.mxu1 %v814_v29 }
 0x103   :  { %v711_v33 = vpop.f32.mrf.mxu0 }
 0x104   :  { %v712_v37 = vadd.f32 %v711_v33, %v693_v34 }
 0x106   :  { %v729_v40 = vpack.c.bf16 %v712_v37, %v712_v37 }
 0x108   :  { %v925_v41 = vunpack.c.l.b16 %v729_v40 }
 0x10a   :  { %v926_v44 = vpack.c.b16 %v925_v41, %v924_v39 }
 0x10c   :  { %938 = vmatpush.bf16.msra.mxu1 %v926_v44 }
 0x151   :  { %v739_v51 = vpop.f32.mrf.mxu1 }
 0x152   :  { %v763_v52 = vsel %vm760_vm1, %v739_v51, -1e+30 }
 0x153   :  { %v766_v53 = vsel %vm765_vm2, %v763_v52, -inf }
 0x154   :  { %767 = vmax.xlane.f32.xlu0 %v766_v53 }
 0x159   :  { %v741_v55 = vpop.f32.mrf.mxu1 }
 0x167   :  { %v752_v57 = vpop.f32.mrf.mxu2 }
 0x168   :  { %v1500_v58 = vsel %vm760_vm1, %v752_v57, -1e+30 }
 0x169   :  { %v769_v59 = vsel %vm765_vm2, %v1500_v58, -inf }
 0x16a   :  { %770 = vmax.xlane.f32.xlu1 %v769_v59 }
 0x16f   :  { %v754_v30 = vpop.f32.mrf.mxu2 }
 0x177   :  { %v846_v61 = vpop.f32.mrf.mxu2 }
 0x178   :  { %v873_v35 = vsel %vm870_vm3, %v846_v61, -1e+30 }
 0x179   :  { %v876_v62 = vsel %vm875_vm4, %v873_v35, -inf }
 0x17a   :  { %877 = vmax.xlane.f32.xlu1 %v876_v62 }
 0x17f   :  { %v848_v43 = vpop.f32.mrf.mxu2 }
 0x1c7   :  { %v768_v63 = vpop.xlane.xlu0 %767 }
 0x1c8   :  { %v772_v36 = vsub.f32 %v763_v52, %v768_v63 }
 0x1ca   :  { %v774_v0 = vmul.f32 1.442695, %v772_v36 }
 0x1cc   :  { %1339 = vpow2.f32 %v774_v0 }
 0x1d2   :  { %v1340_v1 = vpop.eup %1339 }
 0x1d3   :  { %v778_v2 = vsel %vm765_vm2, %v1340_v1, 0.0 }
 0x1d4   :  { %779 = vadd.xlane.f32.xlu0 %v778_v2 }
 0x1dd   :  { %v771_v11 = vpop.xlane.xlu1 %770 }
 0x1de   :  { %v773_v49 = vsub.f32 %v1500_v58, %v771_v11 }
 0x1e0   :  { %v776_v42 = vmul.f32 1.442695, %v773_v49 }
 0x1ed   :  { %v878_v12 = vpop.xlane.xlu1 %877 }
 0x1ee   :  { %v882_v13 = vsub.f32 %v873_v35, %v878_v12 }
 0x1f0   :  { %v884_v14 = vmul.f32 1.442695, %v882_v13 }
 0x1f2   :  { %1341 = vpow2.f32 %v884_v14 }
 0x1f8   :  { %v1342_v15 = vpop.eup %1341 }
 0x1f9   :  { %v888_v16 = vsel %vm875_vm4, %v1342_v15, 0.0 }
 0x1fa   :  { %889 = vadd.xlane.f32.xlu0 %v888_v16 }
 0x247   :  { %v780_v17 = vpop.xlane.xlu0 %779 }
 0x248   :  { %1343 = vrcp.f32 %v780_v17 }
 0x24e   :  { %v1344_v18 = vpop.eup %1343 }
 0x24f   :  { %v786_v19 = vmul.f32 %v1344_v18, %v1340_v1 }
 0x251   :  { %v788_v20 = vpack.c.bf16 %v786_v19, %v786_v19 }
 0x253   :  { %1254 = vmatmul.msk.bf16.vlgmr.msra.gmra.mxu3 %vm765_vm2, %v788_v20 }
 0x263   :  { %864 = vmatmul.bf16.vlgmr.msrb.gmra.mxu3 %v721_v31 }
 0x26d   :  { %v890_v26 = vpop.xlane.xlu0 %889 }
 0x26e   :  { %1345 = vrcp.f32 %v890_v26 }
 0x26f   :  { %1347 = vpow2.f32 %v776_v42 }
 0x274   :  { %v1346_v45 = vpop.eup %1345 }
 0x275   :  { %v896_v46 = vmul.f32 %v1346_v45, %v1342_v15  ;;  %v1348_v54 = vpop.eup %1347 }
 0x276   :  { %v781_v56 = vsel %vm765_vm2, %v1348_v54, 0.0 }
 0x277   :  { %v898_v47 = vpack.c.bf16 %v896_v46, %v896_v46 }
 0x279   :  { %1256 = vmatmul.msk.bf16.vlgmr.msrb.gmra.mxu0 %vm875_vm4, %v898_v47 }
 0x2d6   :  { %v806_v38 = vpop.f32.mrf.mxu3 }
 0x2d7   :  { %829 = vst [vmem:[#allocation7] sm:$0xff] %v806_v38 }
 0x2de   :  { %v808_v48 = vpop.f32.mrf.mxu3 }
 0x2e6   :  { %v865_v51 = vpop.f32.mrf.mxu3 }
 0x2e7   :  { %v874_v52 = vsel %vm870_vm3, %v865_v51, -1e+30 }
 0x2e8   :  { %v879_v53 = vsel %vm875_vm4, %v874_v52, -inf }
 0x2e9   :  { %880 = vmax.xlane.f32.xlu2 %v879_v53 }
 0x2ee   :  { %v867_v55 = vpop.f32.mrf.mxu3 }
 0x2f1   :  { %782 = vadd.xlane.f32.xlu2 %v781_v56 }
 0x2f6   :  { %v918_v57 = vpop.f32.mrf.mxu0 }
 0x2f7   :  { %944 = vst [vmem:[#allocation7 + $0x8] sm:$0xff] %v918_v57 }
 0x2fe   :  { %v920_v59 = vpop.f32.mrf.mxu0 }
 0x35c   :  { %v881_v30 = vpop.xlane.xlu2 %880 }
 0x35d   :  { %v883_v58 = vsub.f32 %v874_v52, %v881_v30 }
 0x35f   :  { %v886_v61 = vmul.f32 1.442695, %v883_v58 }
 0x361   :  { %1349 = vpow2.f32 %v886_v61 }
 0x364   :  { %v783_v35 = vpop.xlane.xlu2 %782 }
 0x365   :  { %1351 = vrcp.f32 %v783_v35 }
 0x367   :  { %v1350_v62 = vpop.eup %1349 }
 0x368   :  { %v891_v50 = vsel %vm875_vm4, %v1350_v62, 0.0 }
 0x369   :  { %892 = vadd.xlane.f32.xlu1 %v891_v50 }
 0x36b   :  { %v1352_v60 = vpop.eup %1351 }
 0x36c   :  { %v787_v43 = vmul.f32 %v1352_v60, %v1348_v54 }
 0x36e   :  { %v789_v63 = vpack.c.bf16 %v787_v43, %v787_v43 }
 0x370   :  { %1255 = vmatmul.msk.bf16.vlgmr.msrb.gmra.mxu1 %vm765_vm2, %v789_v63 }
 0x3dc   :  { %v893_v36 = vpop.xlane.xlu1 %892 }
 0x3dd   :  { %1353 = vrcp.f32 %v893_v36 }
 0x3e3   :  { %v1354_v0 = vpop.eup %1353 }
 0x3e4   :  { %v897_v1 = vmul.f32 %v1354_v0, %v1350_v62 }
 0x3e6   :  { %v899_v2 = vpack.c.bf16 %v897_v1, %v897_v1 }
 0x3e8   :  { %1257 = vmatmul.msk.bf16.vlgmr.msra.gmra.mxu1 %vm875_vm4, %v899_v2 }
 0x3ed   :  { %v825_v3 = vpop.f32.mrf.mxu1 }
 0x3ee   :  { %830 = vst [vmem:[#allocation7 + $0x10] sm:$0xff] %v825_v3 }
 0x3f5   :  { %v827_v4 = vpop.f32.mrf.mxu1 }
 0x465   :  { %v940_v5 = vpop.f32.mrf.mxu1 }
 0x466   :  { %945 = vst [vmem:[#allocation7 + $0x18] sm:$0xff] %v940_v5 }
 0x467   :  { %958 = dma.vmem_to_hbm [thread:$0]  %s951_s1, 512, %s953_s25, [#allocation4], %s1440_s26, %s1440_s26, %s1441_s27  }
 0x46d   :  { %v942_v6 = vpop.f32.mrf.mxu1 }
 0x46e   :  { %1431 = dma.done.wait [#allocation4], 512  }
 0x46f   :  { %1432 = vsyncadd [#allocation4], 4294966784 }
 0x470   :  { %963 = vsyncpa [#allocation3], 1 }
 0x471   :  { %964 = vsyncpa [#allocation6], 1 }
 0x472   :  { %965 = vsyncpa [#allocation4], 1 }

</bundles_post_ra>
